<compile_context>
chip_gen: v5e
topology: v5e:2x2
jax: 0.10.0
libtpu: 0.0.40
codegen_flags: <defaults>
</compile_context>

<pallas_src>
import functools

import numpy as np

import jax
import jax.numpy as jnp
from jax import lax
from jax.experimental import pallas as pl
from jax.experimental.pallas import tpu as pltpu


# ----------------------------- fused Pallas kernel ---------------------------
def _fused_forward_kernel(*refs, num_conv_blocks, neg_slope):
    """Whole-model forward in VMEM.

    Positional refs:
      refs[0]                       x2d    (N*H, W*Cin)           f32
      per conv block (5 refs):      q      (2, N*Ho, N*H)         bf16  row-shift selections
                                    wb     (2, W*Cin, Wo*Cout)    bf16  banded conv weights (BN scale folded in)
                                    shift  (1, Wo*Cout)           f32   folded conv-bias + BN shift
                                    s      (2, Wo*Cout, Wpo*Cout) bf16  even/odd col-pool selections
                                    r      (2, N*Hpo, N*Ho)       bf16  even/odd row-pool selections
      tail:                         u      (HH, N, N*HH)          bf16  flatten row selections
                                    w1     (HH*WW*C, D1)          bf16
                                    b1     (1, D1)                f32
                                    w2     (num_classes, D1)      bf16  torch (out,in) layout
                                    b2     (1, num_classes)       f32
      output:                       o      (N, num_classes)       f32
    """
    f32, bf16 = jnp.float32, jnp.bfloat16

    def dotf(a, b):
        return jnp.dot(a, b, preferred_element_type=f32)

    def leaky(v):
        # 0 < neg_slope < 1  =>  leaky_relu(v) == max(v, neg_slope * v)
        return jnp.maximum(v, neg_slope * v)

    x_ref = refs[0]
    conv_refs = refs[1:1 + 5 * num_conv_blocks]
    u_ref, w1_ref, b1_ref, w2_ref, b2_ref, o_ref = refs[1 + 5 * num_conv_blocks:]

    act = x_ref[...]
    for blk in range(num_conv_blocks):
        q_ref, wb_ref, shift_ref, s_ref, r_ref = conv_refs[5 * blk:5 * blk + 5]
        act_bf = act.astype(bf16)
        # Conv2d(k=2, s=1, p=1): two row-shifted selections x banded weight matrices.
        y = (dotf(dotf(q_ref[0], act_bf).astype(bf16), wb_ref[0]) +
             dotf(dotf(q_ref[1], act_bf).astype(bf16), wb_ref[1]))
        # conv bias + BatchNorm(eval) folded: scale already inside wb, add shift; LeakyReLU.
        y = leaky(y + shift_ref[...])
        # MaxPool2d(2, 2): row-pool first (halves rows before the wider col-pool matmuls).
        y_bf = y.astype(bf16)
        t = jnp.maximum(dotf(r_ref[0], y_bf), dotf(r_ref[1], y_bf))
        t_bf = t.astype(bf16)
        act = jnp.maximum(dotf(t_bf, s_ref[0]), dotf(t_bf, s_ref[1]))

    # Flatten (torch NCHW order folded into w1's row permutation) + Linear 1.
    act_bf = act.astype(bf16)
    hh = u_ref.shape[0]
    chunk = w1_ref.shape[0] // hh
    z = jnp.zeros((u_ref.shape[1], w1_ref.shape[1]), f32)
    for h in range(hh):
        row = dotf(u_ref[h], act_bf).astype(bf16)
        z = z + dotf(row, w1_ref[h * chunk:(h + 1) * chunk, :])
    z = leaky(z + b1_ref[...])
    # TODO(synk): dropout layers are eval-mode identity here.

    # Linear 2: torch (out, in) layout, contract dim 1 of both operands.
    z = lax.dot_general(z.astype(bf16), w2_ref[...],
                        dimension_numbers=(((1,), (1,)), ((), ())),
                        preferred_element_type=f32)
    z = leaky(z + b2_ref[...])

    # Softmax over classes.
    z = z - jnp.max(z, axis=1, keepdims=True)
    e = jnp.exp(z)
    o_ref[...] = e / jnp.sum(e, axis=1, keepdims=True)


# ----------------------------- wrapper ---------------------------------------
def loss_triangle_classifier_forward(x_nchw, fused_ops, *, num_conv_blocks,
                                     num_classes, neg_slope=0.1):
    n, cin, h, w = x_nchw.shape
    # NCHW -> rows = n*H + h, lanes = w*Cin + ci (only activation-side glue op).
    x2d = jnp.transpose(x_nchw, (0, 2, 3, 1)).reshape(n * h, w * cin).astype(jnp.float32)
    kernel = functools.partial(_fused_forward_kernel,
                               num_conv_blocks=num_conv_blocks, neg_slope=neg_slope)
    vmem = pl.BlockSpec(memory_space=pltpu.MemorySpace.VMEM)
    return pl.pallas_call(
        kernel,
        out_shape=jax.ShapeDtypeStruct((n, num_classes), jnp.float32),
        in_specs=[vmem] * (1 + len(fused_ops)),
        out_specs=vmem,
    )(x2d, *fused_ops)


# ----------------------------- operand preparation (host-side, one-time) -----
def build_fused_operands(params, *, batch, input_shape, eps=1e-5):
    """Builds selection / banded / affine matrices consumed by the fused kernel.

    Assumes the module defaults kernel=(2,2), stride=(1,1), padding=(1,1) and
    exactly two linear layers (the module's linear_nodes quirk with len==2).
    """
    cin, h, w = input_shape
    n = batch
    ops = []
    for (cw, cb, gamma, beta, mean, var) in params["conv_blocks"]:
        cw = np.asarray(cw, np.float64)
        cb = np.asarray(cb, np.float64)
        gamma = np.asarray(gamma, np.float64)
        beta = np.asarray(beta, np.float64)
        mean = np.asarray(mean, np.float64)
        var = np.asarray(var, np.float64)
        cout = cw.shape[0]
        ho, wo = h + 1, w + 1          # conv output spatial size (k=2, s=1, p=1)
        hp, wp = ho // 2, wo // 2      # after MaxPool2d(2, 2)

        # Row-shift selections (top/bottom zero padding folded in), block-diag over batch.
        q = np.stack([np.kron(np.eye(n), np.eye(ho, h, k=kh - 1)) for kh in (0, 1)])
        # Banded conv weights: input lanes = w*Cin + ci, output lanes = j*Cout + co.
        pmats = [np.eye(w, wo, k=1 - kw) for kw in (0, 1)]
        wb = np.stack([sum(np.kron(pmats[kw], cw[:, :, kh, kw].T) for kw in (0, 1))
                       for kh in (0, 1)])
        # Eval-mode BatchNorm: fold the scale directly into the banded weights,
        # keep only the (conv-bias + BN) shift as a per-lane add.
        s = gamma / np.sqrt(var + eps)
        wb = wb * np.tile(s, wo)[None, None, :]
        shift = np.tile((cb - mean) * s + beta, wo).reshape(1, -1)
        # 2x2 / stride-2 max-pool selections (even/odd columns, even/odd rows).
        ee = np.zeros((wo, wp)); ee[2 * np.arange(wp), np.arange(wp)] = 1.0
        eo = np.zeros((wo, wp)); eo[2 * np.arange(wp) + 1, np.arange(wp)] = 1.0
        smat = np.stack([np.kron(ee, np.eye(cout)), np.kron(eo, np.eye(cout))])
        re = np.zeros((hp, ho)); re[np.arange(hp), 2 * np.arange(hp)] = 1.0
        ro = np.zeros((hp, ho)); ro[np.arange(hp), 2 * np.arange(hp) + 1] = 1.0
        rmat = np.stack([np.kron(np.eye(n), re), np.kron(np.eye(n), ro)])

        ops += [jnp.asarray(q, jnp.bfloat16), jnp.asarray(wb, jnp.bfloat16),
                jnp.asarray(shift, jnp.float32), jnp.asarray(smat, jnp.bfloat16),
                jnp.asarray(rmat, jnp.bfloat16)]
        h, w, cin = hp, wp, cout

    # Flatten row selections + first linear (torch NCHW flatten order folded into w1).
    hh, ww, c = h, w, cin
    u = np.zeros((hh, n, n * hh))
    for r in range(hh):
        u[r, np.arange(n), np.arange(n) * hh + r] = 1.0
    (w1, b1), (w2, b2) = params["linear"]     # exactly two linear layers expected
    w1 = np.asarray(w1, np.float64)
    w1m = (w1.reshape(w1.shape[0], c, hh, ww)
             .transpose(2, 3, 1, 0)
             .reshape(hh * ww * c, w1.shape[0]))
    ops += [jnp.asarray(u, jnp.bfloat16),
            jnp.asarray(w1m, jnp.bfloat16),
            jnp.asarray(np.asarray(b1).reshape(1, -1), jnp.float32),
            jnp.asarray(np.asarray(w2), jnp.bfloat16),     # torch (out, in) layout
            jnp.asarray(np.asarray(b2).reshape(1, -1), jnp.float32)]
    return tuple(ops)


# ----------------------------- pure-JAX reference (for verification) ---------
def reference_forward(x_nchw, params, *, neg_slope=0.1, eps=1e-5):
    def leaky(v):
        return jnp.where(v >= 0, v, neg_slope * v)

    x = x_nchw.astype(jnp.float32)
    for (cw, cb, gamma, beta, mean, var) in params["conv_blocks"]:
        x = lax.conv_general_dilated(x, cw, window_strides=(1, 1),
                                     padding=((1, 1), (1, 1)),
                                     dimension_numbers=("NCHW", "OIHW", "NCHW"))
        x = x + cb[None, :, None, None]
        s = gamma / jnp.sqrt(var + eps)
        x = (x - mean[None, :, None, None]) * s[None, :, None, None] + beta[None, :, None, None]
        x = leaky(x)
        x = lax.reduce_window(x, -jnp.inf, lax.max, (1, 1, 2, 2), (1, 1, 2, 2), "VALID")
    x = x.reshape(x.shape[0], -1)
    for (w, b) in params["linear"]:
        x = leaky(x @ w.T + b)
    return jax.nn.softmax(x, axis=1)


# ----------------------------- parameter init --------------------------------
def init_params(key, *, cin=1, num_conv_layers=2, base_conv_nodes=8,
                flat_size=256, linear_nodes=(32, 16), num_classes=2):
    params = {"conv_blocks": [], "linear": []}
    prev_c = cin
    for i in range(num_conv_layers):
        c = base_conv_nodes * 2 ** i
        key, k1, k2, k3, k4, k5, k6 = jax.random.split(key, 7)
        conv_w = 0.1 * jax.random.normal(k1, (c, prev_c, 2, 2), jnp.float32)
        conv_b = 0.1 * jax.random.normal(k2, (c,), jnp.float32)
        gamma = 1.0 + 0.1 * jax.random.normal(k3, (c,), jnp.float32)
        beta = 0.1 * jax.random.normal(k4, (c,), jnp.float32)
        run_mean = 0.1 * jax.random.normal(k5, (c,), jnp.float32)
        run_var = 0.5 + 0.5 * jnp.abs(jax.random.normal(k6, (c,), jnp.float32))
        params["conv_blocks"].append((conv_w, conv_b, gamma, beta, run_mean, run_var))
        prev_c = c

    # Linear sizing mirrors the module quirk: layer 0 = flat -> linear_nodes[0],
    # last layer = linear_nodes[-2] -> num_classes.
    dims = []
    in_d = flat_size
    for i, l in enumerate(linear_nodes):
        out_d = num_classes if i == len(linear_nodes) - 1 else l
        dims.append((out_d, in_d))
        in_d = out_d
    for (out_d, in_d) in dims:
        key, k1, k2 = jax.random.split(key, 3)
        w = 0.1 * jax.random.normal(k1, (out_d, in_d), jnp.float32)  # torch (out, in)
        b = 0.1 * jax.random.normal(k2, (out_d,), jnp.float32)
        params["linear"].append((w, b))
    return params


# ----------------------------- main -------------------------------------------
if __name__ == "__main__":
    # Scaled-down module config: input_shape=(1,16,16), num_conv_layers=2,
    # base_conv_nodes=8, kernel=(2,2), stride=(1,1), padding=(1,1),
    # linear_nodes=[32,16], num_classes=2.  Flattened conv output: 16*4*4 = 256.
    batch, num_classes, neg_slope = 2, 2, 0.1
    input_shape = (1, 16, 16)

    key = jax.random.PRNGKey(0)
    key, kx = jax.random.split(key)
    x = jax.random.normal(kx, (batch,) + input_shape, jnp.float32)   # NCHW like PyTorch

    params = init_params(key, cin=1, num_conv_layers=2, base_conv_nodes=8,
                         flat_size=16 * 4 * 4, linear_nodes=(32, 16),
                         num_classes=num_classes)
    fused_ops = build_fused_operands(params, batch=batch, input_shape=input_shape)

    fwd = jax.jit(functools.partial(loss_triangle_classifier_forward,
                                    num_conv_blocks=2, num_classes=num_classes,
                                    neg_slope=neg_slope))
    out = jax.block_until_ready(fwd(x, fused_ops))

    assert out.shape == (batch, num_classes)
    assert bool(jnp.all(jnp.isfinite(out)))
    assert bool(jnp.allclose(jnp.sum(out, axis=1), 1.0, atol=1e-5))

    # Cross-check against a pure-JAX reference of the same eval-mode forward
    # (loose tolerance: kernel uses bf16 MXU operands with f32 accumulation).
    ref = reference_forward(x, params, neg_slope=neg_slope)
    assert bool(jnp.allclose(out, ref, atol=5e-2))

    print("KERNEL_OK")
</pallas_src>

<mosaic_0001>
module attributes {stable_mosaic.version = 11 : i64} {
  func.func @_fused_forward_kernel(%arg0: memref<32x16xf32, #tpu.memory_space<vmem>>, %arg1: memref<2x34x32xbf16, #tpu.memory_space<vmem>>, %arg2: memref<2x16x136xbf16, #tpu.memory_space<vmem>>, %arg3: memref<1x136xf32, #tpu.memory_space<vmem>>, %arg4: memref<2x136x64xbf16, #tpu.memory_space<vmem>>, %arg5: memref<2x16x34xbf16, #tpu.memory_space<vmem>>, %arg6: memref<2x18x16xbf16, #tpu.memory_space<vmem>>, %arg7: memref<2x64x144xbf16, #tpu.memory_space<vmem>>, %arg8: memref<1x144xf32, #tpu.memory_space<vmem>>, %arg9: memref<2x144x64xbf16, #tpu.memory_space<vmem>>, %arg10: memref<2x8x18xbf16, #tpu.memory_space<vmem>>, %arg11: memref<4x2x8xbf16, #tpu.memory_space<vmem>>, %arg12: memref<256x32xbf16, #tpu.memory_space<vmem>>, %arg13: memref<1x32xf32, #tpu.memory_space<vmem>>, %arg14: memref<2x32xbf16, #tpu.memory_space<vmem>>, %arg15: memref<1x2xf32, #tpu.memory_space<vmem>>, %arg16: memref<2x2xf32, #tpu.memory_space<vmem>>) attributes {dimension_semantics = [], scalar_prefetch = 0 : i64, scratch_operands = 0 : i64, tpu.core_type = #tpu.core_type<tc>} {
    %c0 = arith.constant 0 : index
    %c0_0 = arith.constant 0 : index
    %0 = vector.load %arg0[%c0, %c0_0] : memref<32x16xf32, #tpu.memory_space<vmem>>, vector<32x16xf32>
    %1 = arith.truncf %0 : vector<32x16xf32> to vector<32x16xbf16>
    %c0_1 = arith.constant 0 : index
    %c0_2 = arith.constant 0 : index
    %c0_3 = arith.constant 0 : index
    %2 = vector.load %arg1[%c0_1, %c0_2, %c0_3] : memref<2x34x32xbf16, #tpu.memory_space<vmem>>, vector<1x34x32xbf16>
    %3 = vector.shape_cast %2 : vector<1x34x32xbf16> to vector<34x32xbf16>
    %cst = arith.constant dense<0.000000e+00> : vector<34x16xf32>
    %4 = tpu.matmul %3, %1, %cst {dimension_numbers = #tpu.dot_dimension_numbers<[1], [0], [0], [1], [0, 0, 1, 1], [], []>} : vector<34x32xbf16>, vector<32x16xbf16>, vector<34x16xf32> -> vector<34x16xf32>
    %5 = arith.truncf %4 : vector<34x16xf32> to vector<34x16xbf16>
    %c0_4 = arith.constant 0 : index
    %c0_5 = arith.constant 0 : index
    %c0_6 = arith.constant 0 : index
    %6 = vector.load %arg2[%c0_4, %c0_5, %c0_6] : memref<2x16x136xbf16, #tpu.memory_space<vmem>>, vector<1x16x136xbf16>
    %7 = vector.shape_cast %6 : vector<1x16x136xbf16> to vector<16x136xbf16>
    %cst_7 = arith.constant dense<0.000000e+00> : vector<34x136xf32>
    %8 = tpu.matmul %5, %7, %cst_7 {dimension_numbers = #tpu.dot_dimension_numbers<[1], [0], [0], [1], [0, 0, 1, 1], [], []>} : vector<34x16xbf16>, vector<16x136xbf16>, vector<34x136xf32> -> vector<34x136xf32>
    %c1 = arith.constant 1 : index
    %c0_8 = arith.constant 0 : index
    %c0_9 = arith.constant 0 : index
    %9 = vector.load %arg1[%c1, %c0_8, %c0_9] : memref<2x34x32xbf16, #tpu.memory_space<vmem>>, vector<1x34x32xbf16>
    %10 = vector.shape_cast %9 : vector<1x34x32xbf16> to vector<34x32xbf16>
    %cst_10 = arith.constant dense<0.000000e+00> : vector<34x16xf32>
    %11 = tpu.matmul %10, %1, %cst_10 {dimension_numbers = #tpu.dot_dimension_numbers<[1], [0], [0], [1], [0, 0, 1, 1], [], []>} : vector<34x32xbf16>, vector<32x16xbf16>, vector<34x16xf32> -> vector<34x16xf32>
    %12 = arith.truncf %11 : vector<34x16xf32> to vector<34x16xbf16>
    %c1_11 = arith.constant 1 : index
    %c0_12 = arith.constant 0 : index
    %c0_13 = arith.constant 0 : index
    %13 = vector.load %arg2[%c1_11, %c0_12, %c0_13] : memref<2x16x136xbf16, #tpu.memory_space<vmem>>, vector<1x16x136xbf16>
    %14 = vector.shape_cast %13 : vector<1x16x136xbf16> to vector<16x136xbf16>
    %cst_14 = arith.constant dense<0.000000e+00> : vector<34x136xf32>
    %15 = tpu.matmul %12, %14, %cst_14 {dimension_numbers = #tpu.dot_dimension_numbers<[1], [0], [0], [1], [0, 0, 1, 1], [], []>} : vector<34x16xbf16>, vector<16x136xbf16>, vector<34x136xf32> -> vector<34x136xf32>
    %16 = arith.addf %8, %15 : vector<34x136xf32>
    %c0_15 = arith.constant 0 : index
    %c0_16 = arith.constant 0 : index
    %17 = vector.load %arg3[%c0_15, %c0_16] : memref<1x136xf32, #tpu.memory_space<vmem>>, vector<1x136xf32>
    %18 = vector.broadcast %17 : vector<1x136xf32> to vector<34x136xf32>
    %19 = arith.addf %16, %18 : vector<34x136xf32>
    %cst_17 = arith.constant 1.000000e-01 : f32
    %20 = vector.broadcast %cst_17 : f32 to vector<34x136xf32>
    %21 = arith.mulf %20, %19 : vector<34x136xf32>
    %22 = arith.maximumf %19, %21 : vector<34x136xf32>
    %23 = arith.truncf %22 : vector<34x136xf32> to vector<34x136xbf16>
    %c0_18 = arith.constant 0 : index
    %c0_19 = arith.constant 0 : index
    %c0_20 = arith.constant 0 : index
    %24 = vector.load %arg5[%c0_18, %c0_19, %c0_20] : memref<2x16x34xbf16, #tpu.memory_space<vmem>>, vector<1x16x34xbf16>
    %25 = vector.shape_cast %24 : vector<1x16x34xbf16> to vector<16x34xbf16>
    %cst_21 = arith.constant dense<0.000000e+00> : vector<16x136xf32>
    %26 = tpu.matmul %25, %23, %cst_21 {dimension_numbers = #tpu.dot_dimension_numbers<[1], [0], [0], [1], [0, 0, 1, 1], [], []>} : vector<16x34xbf16>, vector<34x136xbf16>, vector<16x136xf32> -> vector<16x136xf32>
    %c1_22 = arith.constant 1 : index
    %c0_23 = arith.constant 0 : index
    %c0_24 = arith.constant 0 : index
    %27 = vector.load %arg5[%c1_22, %c0_23, %c0_24] : memref<2x16x34xbf16, #tpu.memory_space<vmem>>, vector<1x16x34xbf16>
    %28 = vector.shape_cast %27 : vector<1x16x34xbf16> to vector<16x34xbf16>
    %cst_25 = arith.constant dense<0.000000e+00> : vector<16x136xf32>
    %29 = tpu.matmul %28, %23, %cst_25 {dimension_numbers = #tpu.dot_dimension_numbers<[1], [0], [0], [1], [0, 0, 1, 1], [], []>} : vector<16x34xbf16>, vector<34x136xbf16>, vector<16x136xf32> -> vector<16x136xf32>
    %30 = arith.maximumf %26, %29 : vector<16x136xf32>
    %31 = arith.truncf %30 : vector<16x136xf32> to vector<16x136xbf16>
    %c0_26 = arith.constant 0 : index
    %c0_27 = arith.constant 0 : index
    %c0_28 = arith.constant 0 : index
    %32 = vector.load %arg4[%c0_26, %c0_27, %c0_28] : memref<2x136x64xbf16, #tpu.memory_space<vmem>>, vector<1x136x64xbf16>
    %33 = vector.shape_cast %32 : vector<1x136x64xbf16> to vector<136x64xbf16>
    %cst_29 = arith.constant dense<0.000000e+00> : vector<16x64xf32>
    %34 = tpu.matmul %31, %33, %cst_29 {dimension_numbers = #tpu.dot_dimension_numbers<[1], [0], [0], [1], [0, 0, 1, 1], [], []>} : vector<16x136xbf16>, vector<136x64xbf16>, vector<16x64xf32> -> vector<16x64xf32>
    %c1_30 = arith.constant 1 : index
    %c0_31 = arith.constant 0 : index
    %c0_32 = arith.constant 0 : index
    %35 = vector.load %arg4[%c1_30, %c0_31, %c0_32] : memref<2x136x64xbf16, #tpu.memory_space<vmem>>, vector<1x136x64xbf16>
    %36 = vector.shape_cast %35 : vector<1x136x64xbf16> to vector<136x64xbf16>
    %cst_33 = arith.constant dense<0.000000e+00> : vector<16x64xf32>
    %37 = tpu.matmul %31, %36, %cst_33 {dimension_numbers = #tpu.dot_dimension_numbers<[1], [0], [0], [1], [0, 0, 1, 1], [], []>} : vector<16x136xbf16>, vector<136x64xbf16>, vector<16x64xf32> -> vector<16x64xf32>
    %38 = arith.maximumf %34, %37 : vector<16x64xf32>
    %39 = arith.truncf %38 : vector<16x64xf32> to vector<16x64xbf16>
    %c0_34 = arith.constant 0 : index
    %c0_35 = arith.constant 0 : index
    %c0_36 = arith.constant 0 : index
    %40 = vector.load %arg6[%c0_34, %c0_35, %c0_36] : memref<2x18x16xbf16, #tpu.memory_space<vmem>>, vector<1x18x16xbf16>
    %41 = vector.shape_cast %40 : vector<1x18x16xbf16> to vector<18x16xbf16>
    %cst_37 = arith.constant dense<0.000000e+00> : vector<18x64xf32>
    %42 = tpu.matmul %41, %39, %cst_37 {dimension_numbers = #tpu.dot_dimension_numbers<[1], [0], [0], [1], [0, 0, 1, 1], [], []>} : vector<18x16xbf16>, vector<16x64xbf16>, vector<18x64xf32> -> vector<18x64xf32>
    %43 = arith.truncf %42 : vector<18x64xf32> to vector<18x64xbf16>
    %c0_38 = arith.constant 0 : index
    %c0_39 = arith.constant 0 : index
    %c0_40 = arith.constant 0 : index
    %44 = vector.load %arg7[%c0_38, %c0_39, %c0_40] : memref<2x64x144xbf16, #tpu.memory_space<vmem>>, vector<1x64x144xbf16>
    %45 = vector.shape_cast %44 : vector<1x64x144xbf16> to vector<64x144xbf16>
    %cst_41 = arith.constant dense<0.000000e+00> : vector<18x144xf32>
    %46 = tpu.matmul %43, %45, %cst_41 {dimension_numbers = #tpu.dot_dimension_numbers<[1], [0], [0], [1], [0, 0, 1, 1], [], []>} : vector<18x64xbf16>, vector<64x144xbf16>, vector<18x144xf32> -> vector<18x144xf32>
    %c1_42 = arith.constant 1 : index
    %c0_43 = arith.constant 0 : index
    %c0_44 = arith.constant 0 : index
    %47 = vector.load %arg6[%c1_42, %c0_43, %c0_44] : memref<2x18x16xbf16, #tpu.memory_space<vmem>>, vector<1x18x16xbf16>
    %48 = vector.shape_cast %47 : vector<1x18x16xbf16> to vector<18x16xbf16>
    %cst_45 = arith.constant dense<0.000000e+00> : vector<18x64xf32>
    %49 = tpu.matmul %48, %39, %cst_45 {dimension_numbers = #tpu.dot_dimension_numbers<[1], [0], [0], [1], [0, 0, 1, 1], [], []>} : vector<18x16xbf16>, vector<16x64xbf16>, vector<18x64xf32> -> vector<18x64xf32>
    %50 = arith.truncf %49 : vector<18x64xf32> to vector<18x64xbf16>
    %c1_46 = arith.constant 1 : index
    %c0_47 = arith.constant 0 : index
    %c0_48 = arith.constant 0 : index
    %51 = vector.load %arg7[%c1_46, %c0_47, %c0_48] : memref<2x64x144xbf16, #tpu.memory_space<vmem>>, vector<1x64x144xbf16>
    %52 = vector.shape_cast %51 : vector<1x64x144xbf16> to vector<64x144xbf16>
    %cst_49 = arith.constant dense<0.000000e+00> : vector<18x144xf32>
    %53 = tpu.matmul %50, %52, %cst_49 {dimension_numbers = #tpu.dot_dimension_numbers<[1], [0], [0], [1], [0, 0, 1, 1], [], []>} : vector<18x64xbf16>, vector<64x144xbf16>, vector<18x144xf32> -> vector<18x144xf32>
    %54 = arith.addf %46, %53 : vector<18x144xf32>
    %c0_50 = arith.constant 0 : index
    %c0_51 = arith.constant 0 : index
    %55 = vector.load %arg8[%c0_50, %c0_51] : memref<1x144xf32, #tpu.memory_space<vmem>>, vector<1x144xf32>
    %56 = vector.broadcast %55 : vector<1x144xf32> to vector<18x144xf32>
    %57 = arith.addf %54, %56 : vector<18x144xf32>
    %cst_52 = arith.constant 1.000000e-01 : f32
    %58 = vector.broadcast %cst_52 : f32 to vector<18x144xf32>
    %59 = arith.mulf %58, %57 : vector<18x144xf32>
    %60 = arith.maximumf %57, %59 : vector<18x144xf32>
    %61 = arith.truncf %60 : vector<18x144xf32> to vector<18x144xbf16>
    %c0_53 = arith.constant 0 : index
    %c0_54 = arith.constant 0 : index
    %c0_55 = arith.constant 0 : index
    %62 = vector.load %arg10[%c0_53, %c0_54, %c0_55] : memref<2x8x18xbf16, #tpu.memory_space<vmem>>, vector<1x8x18xbf16>
    %63 = vector.shape_cast %62 : vector<1x8x18xbf16> to vector<8x18xbf16>
    %cst_56 = arith.constant dense<0.000000e+00> : vector<8x144xf32>
    %64 = tpu.matmul %63, %61, %cst_56 {dimension_numbers = #tpu.dot_dimension_numbers<[1], [0], [0], [1], [0, 0, 1, 1], [], []>} : vector<8x18xbf16>, vector<18x144xbf16>, vector<8x144xf32> -> vector<8x144xf32>
    %c1_57 = arith.constant 1 : index
    %c0_58 = arith.constant 0 : index
    %c0_59 = arith.constant 0 : index
    %65 = vector.load %arg10[%c1_57, %c0_58, %c0_59] : memref<2x8x18xbf16, #tpu.memory_space<vmem>>, vector<1x8x18xbf16>
    %66 = vector.shape_cast %65 : vector<1x8x18xbf16> to vector<8x18xbf16>
    %cst_60 = arith.constant dense<0.000000e+00> : vector<8x144xf32>
    %67 = tpu.matmul %66, %61, %cst_60 {dimension_numbers = #tpu.dot_dimension_numbers<[1], [0], [0], [1], [0, 0, 1, 1], [], []>} : vector<8x18xbf16>, vector<18x144xbf16>, vector<8x144xf32> -> vector<8x144xf32>
    %68 = arith.maximumf %64, %67 : vector<8x144xf32>
    %69 = arith.truncf %68 : vector<8x144xf32> to vector<8x144xbf16>
    %c0_61 = arith.constant 0 : index
    %c0_62 = arith.constant 0 : index
    %c0_63 = arith.constant 0 : index
    %70 = vector.load %arg9[%c0_61, %c0_62, %c0_63] : memref<2x144x64xbf16, #tpu.memory_space<vmem>>, vector<1x144x64xbf16>
    %71 = vector.shape_cast %70 : vector<1x144x64xbf16> to vector<144x64xbf16>
    %cst_64 = arith.constant dense<0.000000e+00> : vector<8x64xf32>
    %72 = tpu.matmul %69, %71, %cst_64 {dimension_numbers = #tpu.dot_dimension_numbers<[1], [0], [0], [1], [0, 0, 1, 1], [], []>} : vector<8x144xbf16>, vector<144x64xbf16>, vector<8x64xf32> -> vector<8x64xf32>
    %c1_65 = arith.constant 1 : index
    %c0_66 = arith.constant 0 : index
    %c0_67 = arith.constant 0 : index
    %73 = vector.load %arg9[%c1_65, %c0_66, %c0_67] : memref<2x144x64xbf16, #tpu.memory_space<vmem>>, vector<1x144x64xbf16>
    %74 = vector.shape_cast %73 : vector<1x144x64xbf16> to vector<144x64xbf16>
    %cst_68 = arith.constant dense<0.000000e+00> : vector<8x64xf32>
    %75 = tpu.matmul %69, %74, %cst_68 {dimension_numbers = #tpu.dot_dimension_numbers<[1], [0], [0], [1], [0, 0, 1, 1], [], []>} : vector<8x144xbf16>, vector<144x64xbf16>, vector<8x64xf32> -> vector<8x64xf32>
    %76 = arith.maximumf %72, %75 : vector<8x64xf32>
    %77 = arith.truncf %76 : vector<8x64xf32> to vector<8x64xbf16>
    %cst_69 = arith.constant 0.000000e+00 : f32
    %78 = vector.broadcast %cst_69 : f32 to vector<2x32xf32>
    %c0_70 = arith.constant 0 : index
    %c0_71 = arith.constant 0 : index
    %c0_72 = arith.constant 0 : index
    %79 = vector.load %arg11[%c0_70, %c0_71, %c0_72] : memref<4x2x8xbf16, #tpu.memory_space<vmem>>, vector<1x2x8xbf16>
    %80 = vector.shape_cast %79 : vector<1x2x8xbf16> to vector<2x8xbf16>
    %cst_73 = arith.constant dense<0.000000e+00> : vector<2x64xf32>
    %81 = tpu.matmul %80, %77, %cst_73 {dimension_numbers = #tpu.dot_dimension_numbers<[1], [0], [0], [1], [0, 0, 1, 1], [], []>} : vector<2x8xbf16>, vector<8x64xbf16>, vector<2x64xf32> -> vector<2x64xf32>
    %82 = arith.truncf %81 : vector<2x64xf32> to vector<2x64xbf16>
    %c0_74 = arith.constant 0 : index
    %c0_75 = arith.constant 0 : index
    %83 = vector.load %arg12[%c0_74, %c0_75] : memref<256x32xbf16, #tpu.memory_space<vmem>>, vector<64x32xbf16>
    %cst_76 = arith.constant dense<0.000000e+00> : vector<2x32xf32>
    %84 = tpu.matmul %82, %83, %cst_76 {dimension_numbers = #tpu.dot_dimension_numbers<[1], [0], [0], [1], [0, 0, 1, 1], [], []>} : vector<2x64xbf16>, vector<64x32xbf16>, vector<2x32xf32> -> vector<2x32xf32>
    %85 = arith.addf %78, %84 : vector<2x32xf32>
    %c1_77 = arith.constant 1 : index
    %c0_78 = arith.constant 0 : index
    %c0_79 = arith.constant 0 : index
    %86 = vector.load %arg11[%c1_77, %c0_78, %c0_79] : memref<4x2x8xbf16, #tpu.memory_space<vmem>>, vector<1x2x8xbf16>
    %87 = vector.shape_cast %86 : vector<1x2x8xbf16> to vector<2x8xbf16>
    %cst_80 = arith.constant dense<0.000000e+00> : vector<2x64xf32>
    %88 = tpu.matmul %87, %77, %cst_80 {dimension_numbers = #tpu.dot_dimension_numbers<[1], [0], [0], [1], [0, 0, 1, 1], [], []>} : vector<2x8xbf16>, vector<8x64xbf16>, vector<2x64xf32> -> vector<2x64xf32>
    %89 = arith.truncf %88 : vector<2x64xf32> to vector<2x64xbf16>
    %c64 = arith.constant 64 : index
    %c0_81 = arith.constant 0 : index
    %90 = vector.load %arg12[%c64, %c0_81] : memref<256x32xbf16, #tpu.memory_space<vmem>>, vector<64x32xbf16>
    %cst_82 = arith.constant dense<0.000000e+00> : vector<2x32xf32>
    %91 = tpu.matmul %89, %90, %cst_82 {dimension_numbers = #tpu.dot_dimension_numbers<[1], [0], [0], [1], [0, 0, 1, 1], [], []>} : vector<2x64xbf16>, vector<64x32xbf16>, vector<2x32xf32> -> vector<2x32xf32>
    %92 = arith.addf %85, %91 : vector<2x32xf32>
    %c2 = arith.constant 2 : index
    %c0_83 = arith.constant 0 : index
    %c0_84 = arith.constant 0 : index
    %93 = vector.load %arg11[%c2, %c0_83, %c0_84] : memref<4x2x8xbf16, #tpu.memory_space<vmem>>, vector<1x2x8xbf16>
    %94 = vector.shape_cast %93 : vector<1x2x8xbf16> to vector<2x8xbf16>
    %cst_85 = arith.constant dense<0.000000e+00> : vector<2x64xf32>
    %95 = tpu.matmul %94, %77, %cst_85 {dimension_numbers = #tpu.dot_dimension_numbers<[1], [0], [0], [1], [0, 0, 1, 1], [], []>} : vector<2x8xbf16>, vector<8x64xbf16>, vector<2x64xf32> -> vector<2x64xf32>
    %96 = arith.truncf %95 : vector<2x64xf32> to vector<2x64xbf16>
    %c128 = arith.constant 128 : index
    %c0_86 = arith.constant 0 : index
    %97 = vector.load %arg12[%c128, %c0_86] : memref<256x32xbf16, #tpu.memory_space<vmem>>, vector<64x32xbf16>
    %cst_87 = arith.constant dense<0.000000e+00> : vector<2x32xf32>
    %98 = tpu.matmul %96, %97, %cst_87 {dimension_numbers = #tpu.dot_dimension_numbers<[1], [0], [0], [1], [0, 0, 1, 1], [], []>} : vector<2x64xbf16>, vector<64x32xbf16>, vector<2x32xf32> -> vector<2x32xf32>
    %99 = arith.addf %92, %98 : vector<2x32xf32>
    %c3 = arith.constant 3 : index
    %c0_88 = arith.constant 0 : index
    %c0_89 = arith.constant 0 : index
    %100 = vector.load %arg11[%c3, %c0_88, %c0_89] : memref<4x2x8xbf16, #tpu.memory_space<vmem>>, vector<1x2x8xbf16>
    %101 = vector.shape_cast %100 : vector<1x2x8xbf16> to vector<2x8xbf16>
    %cst_90 = arith.constant dense<0.000000e+00> : vector<2x64xf32>
    %102 = tpu.matmul %101, %77, %cst_90 {dimension_numbers = #tpu.dot_dimension_numbers<[1], [0], [0], [1], [0, 0, 1, 1], [], []>} : vector<2x8xbf16>, vector<8x64xbf16>, vector<2x64xf32> -> vector<2x64xf32>
    %103 = arith.truncf %102 : vector<2x64xf32> to vector<2x64xbf16>
    %c192 = arith.constant 192 : index
    %c0_91 = arith.constant 0 : index
    %104 = vector.load %arg12[%c192, %c0_91] : memref<256x32xbf16, #tpu.memory_space<vmem>>, vector<64x32xbf16>
    %cst_92 = arith.constant dense<0.000000e+00> : vector<2x32xf32>
    %105 = tpu.matmul %103, %104, %cst_92 {dimension_numbers = #tpu.dot_dimension_numbers<[1], [0], [0], [1], [0, 0, 1, 1], [], []>} : vector<2x64xbf16>, vector<64x32xbf16>, vector<2x32xf32> -> vector<2x32xf32>
    %106 = arith.addf %99, %105 : vector<2x32xf32>
    %c0_93 = arith.constant 0 : index
    %c0_94 = arith.constant 0 : index
    %107 = vector.load %arg13[%c0_93, %c0_94] : memref<1x32xf32, #tpu.memory_space<vmem>>, vector<1x32xf32>
    %108 = vector.broadcast %107 : vector<1x32xf32> to vector<2x32xf32>
    %109 = arith.addf %106, %108 : vector<2x32xf32>
    %cst_95 = arith.constant 1.000000e-01 : f32
    %110 = vector.broadcast %cst_95 : f32 to vector<2x32xf32>
    %111 = arith.mulf %110, %109 : vector<2x32xf32>
    %112 = arith.maximumf %109, %111 : vector<2x32xf32>
    %113 = arith.truncf %112 : vector<2x32xf32> to vector<2x32xbf16>
    %c0_96 = arith.constant 0 : index
    %c0_97 = arith.constant 0 : index
    %114 = vector.load %arg14[%c0_96, %c0_97] : memref<2x32xbf16, #tpu.memory_space<vmem>>, vector<2x32xbf16>
    %cst_98 = arith.constant dense<0.000000e+00> : vector<2x2xf32>
    %115 = tpu.matmul %113, %114, %cst_98 {dimension_numbers = #tpu.dot_dimension_numbers<[1], [1], [0], [0], [0, 0, 1, 0], [], []>} : vector<2x32xbf16>, vector<2x32xbf16>, vector<2x2xf32> -> vector<2x2xf32>
    %c0_99 = arith.constant 0 : index
    %c0_100 = arith.constant 0 : index
    %116 = vector.load %arg15[%c0_99, %c0_100] : memref<1x2xf32, #tpu.memory_space<vmem>>, vector<1x2xf32>
    %117 = vector.broadcast %116 : vector<1x2xf32> to vector<2x2xf32>
    %118 = arith.addf %115, %117 : vector<2x2xf32>
    %cst_101 = arith.constant 1.000000e-01 : f32
    %119 = vector.broadcast %cst_101 : f32 to vector<2x2xf32>
    %120 = arith.mulf %119, %118 : vector<2x2xf32>
    %121 = arith.maximumf %118, %120 : vector<2x2xf32>
    %cst_102 = arith.constant dense<0xFF800000> : vector<2xf32>
    %122 = vector.multi_reduction <maximumf>, %121, %cst_102 [1] : vector<2x2xf32> to vector<2xf32>
    %123 = vector.shape_cast %122 : vector<2xf32> to vector<2x1xf32>
    %124 = vector.broadcast %123 : vector<2x1xf32> to vector<2x2xf32>
    %125 = arith.subf %121, %124 : vector<2x2xf32>
    %126 = math.exp %125 : vector<2x2xf32>
    %cst_103 = arith.constant dense<0.000000e+00> : vector<2xf32>
    %127 = vector.multi_reduction <add>, %126, %cst_103 [1] : vector<2x2xf32> to vector<2xf32>
    %128 = vector.shape_cast %127 : vector<2xf32> to vector<2x1xf32>
    %129 = vector.broadcast %128 : vector<2x1xf32> to vector<2x2xf32>
    %130 = arith.divf %126, %129 : vector<2x2xf32>
    %c0_104 = arith.constant 0 : index
    %c0_105 = arith.constant 0 : index
    %131 = vector.load %arg16[%c0_104, %c0_105] : memref<2x2xf32, #tpu.memory_space<vmem>>, vector<2x2xf32>
    tpu.vector_store %arg16[%c0_104, %c0_105], %130 {strides = array<i32>} : memref<2x2xf32, #tpu.memory_space<vmem>>, vector<2x2xf32>,
    return
  }
}

</mosaic_0001>

<bundles_post_ra>
// kernel: loss_triangle_classifier_forward.1
= control target key start
LH: loop header
LB: loop body
LE: loop exit
PB: predicated region body
PF: predicated region fallthrough
CT: control target
= control target key end

     0   :  { %s2585_s0 = inlined_call_operand.vmem [shape: f32[32,16], index: 0, kind: input, shape index: {}]   ;;  %s2586_s1 = inlined_call_operand.vmem [shape: bf16[2,34,32], index: 1, kind: input, shape index: {}]   ;;  %s2587_s2 = inlined_call_operand.vmem [shape: bf16[2,16,136], index: 2, kind: input, shape index: {}]   ;;  %s2588_s3 = inlined_call_operand.vmem [shape: f32[1,136], index: 3, kind: input, shape index: {}]   ;;  %s2589_s4 = inlined_call_operand.vmem [shape: bf16[2,136,64], index: 4, kind: input, shape index: {}]   ;;  %s2590_s5 = inlined_call_operand.vmem [shape: bf16[2,16,34], index: 5, kind: input, shape index: {}]   ;;  %s2591_s6 = inlined_call_operand.vmem [shape: bf16[2,18,16], index: 6, kind: input, shape index: {}]   ;;  %s2592_s7 = inlined_call_operand.vmem [shape: bf16[2,64,144], index: 7, kind: input, shape index: {}]   ;;  %s2593_s8 = inlined_call_operand.vmem [shape: f32[1,144], index: 8, kind: input, shape index: {}]   ;;  %s2594_s9 = inlined_call_operand.vmem [shape: bf16[2,144,64], index: 9, kind: input, shape index: {}]   ;;  %s2595_s10 = inlined_call_operand.vmem [shape: bf16[2,8,18], index: 10, kind: input, shape index: {}]   ;;  %s2596_s11 = inlined_call_operand.vmem [shape: bf16[4,2,8], index: 11, kind: input, shape index: {}]   ;;  %s2597_s12 = inlined_call_operand.vmem [shape: bf16[256,32], index: 12, kind: input, shape index: {}]   ;;  %s2598_s13 = inlined_call_operand.vmem [shape: f32[1,32], index: 13, kind: input, shape index: {}]   ;;  %s2599_s14 = inlined_call_operand.vmem [shape: bf16[2,32], index: 14, kind: input, shape index: {}]   ;;  %s2600_s15 = inlined_call_operand.vmem [shape: f32[1,2], index: 15, kind: input, shape index: {}]   ;;  %s2601_s16 = inlined_call_operand.hbm [shape: f32[2,2], index: 16, kind: output, shape index: {}]  }
   0x1   :  { %2603 = sst [smem:[#allocation5_spill]] %s2585_s0 }
   0x2   :  { %s2604_s23 = sld [smem:[#allocation5_spill]] }
   0x8   :  { %v57_v0 = vld [vmem:[%s2604_s23 + $0x10] sm:$0xff]  ;;  %v58_v1 = vld [vmem:[%s2604_s23 + $0x18] sm:$0xff]  ;;  %v55_v2 = vld [vmem:[%s2604_s23] sm:$0xff] }
   0x9   :  { %v60_v3 = vpack.c.bf16 %v58_v1, %v57_v0  ;;  %v56_v4 = vld [vmem:[%s2604_s23 + $0x8] sm:$0xff] }
   0xa   :  { %v59_v5 = vpack.c.bf16 %v56_v4, %v55_v2 }
   0xb   :  { %151 = vmatpush.bf16.msra.mxu1 %v60_v3  ;;  %95 = vmatpush.bf16.msra.mxu0 %v60_v3 }
   0xc   :  { %21 = vsyncpa [#allocation3], 0  ;;  %v1978_v6 = vld [vmem:[%s2586_s1 + $0x14] sm:$0xff]  ;;  %vm79_vm0 = vcmask 261120   ;;  %v1974_v7 = vld [vmem:[%s2586_s1] sm:$0xff]  ;;  %vm184_vm1 = vcmask 130048  }
   0xd   :  { %v1979_v8 = vld [vmem:[%s2586_s1 + $0x1c] sm:$0xff]  ;;  %v1975_v9 = vld [vmem:[%s2586_s1 + $0x8] sm:$0xff]  ;;  %v1567_v10 = vld [vmem:[%s2586_s1 + $0x24] sm:$0x1]  ;;  %vm358_vm2 = vcmask 1040384   ;;  %vm354_vm3 = vcmask 277504  }
   0xe   :  { %v65_v11 = vld [vmem:[%s2586_s1 + $0x10] sm:$0x1]  ;;  %v132_v12 = vunpack.c.l.b16 %v1567_v10  ;;  %v1981_v17 = vld [vmem:[%s2587_s2 + $0x14] sm:$0xf0]  ;;  %v1980_v18 = vld [vmem:[%s2587_s2 + $0x14] sm:$0xf] }
   0xf   :  { %152 = vmatpush.bf16.msra.mxu1 %v59_v5  ;;  %96 = vmatpush.bf16.msra.mxu0 %v59_v5  ;;  %v75_v13 = vunpack.c.l.b16 %v65_v11  ;;  %v1583_v16 = vld [vmem:[%s2587_s2 + $0x10] sm:$0xf]  ;;  %v1585_v20 = vld [vmem:[%s2587_s2 + $0x18] sm:$0xf0]  ;;  %v1597_v26 = vld [vmem:[%s2587_s2] sm:$0xf] }
  0x10   :  { %v135_v14 = vpack.c.b16 %v132_v12, %v132_v12  ;;  %v1584_v19 = vor.u32 %v1981_v17, %v1583_v16  ;;  %v1588_v21 = vor.u32 %v1980_v18, %v1585_v20  ;;  %v1977_v27 = vld [vmem:[%s2587_s2 + $0x4] sm:$0xf0]  ;;  %v1976_v28 = vld [vmem:[%s2587_s2 + $0x4] sm:$0xf]  ;;  %v1599_v30 = vld [vmem:[%s2587_s2 + $0x8] sm:$0xf0] }
  0x11   :  { %v78_v15 = vpack.c.b16 %v75_v13, %v75_v13  ;;  %v1598_v29 = vor.u32 %v1977_v27, %v1597_v26  ;;  %v1602_v31 = vor.u32 %v1976_v28, %v1599_v30  ;;  %v305_v2 = vld [vmem:[%s2588_s3] sm:$0x3]  ;;  %vm510_vm4 = vcmask 1043456  }
  0x12   :  { %1576 = vmatmul.msk.bf16.vlgmr.msra.gmra.mxu1 %vm79_vm0, %v1978_v6  ;;  %1560 = vmatmul.msk.bf16.vlgmr.msra.gmra.mxu0 %vm79_vm0, %v1974_v7  ;;  %v307_v5 = vperm.slane %v305_v2, 0  ;;  %v308_v6 = vperm.slane %v305_v2, 1  ;;  %v1996_v2 = vld [vmem:[%s2589_s4 + $0x64] sm:$0xff]  ;;  %vm506_vm5 = vcmask 64512   ;;  %vm777_vm6 = vcmask 523264  }
  0x13   :  { %201 = vmatpush.bf16.msra.mxu2 %v1584_v19  ;;  %224 = vmatpush.bf16.msra.mxu3 %v1588_v21  ;;  %vm931_vm7 = vcmask 146432   ;;  %vm1510_vm8 = vcmask 9216  }
  0x17   :  { %266 = vmatpush.bf16.msrb.mxu2 %v1598_v29  ;;  %289 = vmatpush.bf16.msrb.mxu3 %v1602_v31 }
  0x22   :  { %1577 = vmatmul.msk.bf16.gmra.mxu1 %vm79_vm0, %v1979_v8  ;;  %1561 = vmatmul.msk.bf16.gmra.mxu0 %vm79_vm0, %v1975_v9 }
  0x32   :  { %1578 = vmatmul.msk.bf16.gmra.mxu1 %vm79_vm0, %v135_v14  ;;  %1562 = vmatmul.msk.bf16.gmra.mxu0 %vm79_vm0, %v78_v15 }
  0x8f   :  { %v154_v22 = vpop.f32.mrf.mxu1  ;;  %v98_v23 = vpop.f32.mrf.mxu0 }
  0x97   :  { %v156_v24 = vpop.f32.mrf.mxu1  ;;  %v100_v32 = vpop.f32.mrf.mxu0 }
  0x98   :  { %v168_v25 = vpack.c.bf16 %v156_v24, %v154_v22  ;;  %v112_v43 = vpack.c.bf16 %v100_v32, %v98_v23  ;;  %v1991_v32 = vld [vmem:[%s2589_s4 + $0x38] sm:$0xff] }
  0x9a   :  { %1589 = vmatmul.msk.bf16.vlgmr.msra.gmra.mxu2 %vm184_vm1, %v168_v25  ;;  %1592 = vmatmul.msk.bf16.vlgmr.msra.gmra.mxu3 %vm184_vm1, %v168_v25 }
  0x9b   :  { %514 = vmatpush.bf16.msra.mxu2 %v1991_v32 }
  0x9f   :  { %v159_v33 = vpop.f32.mrf.mxu1  ;;  %v103_v36 = vpop.f32.mrf.mxu0 }
  0xa7   :  { %v161_v34 = vpop.f32.mrf.mxu1  ;;  %v105_v38 = vpop.f32.mrf.mxu0 }
  0xa8   :  { %v169_v35 = vpack.c.bf16 %v161_v34, %v159_v33  ;;  %v113_v44 = vpack.c.bf16 %v105_v38, %v103_v36  ;;  %v1999_v33 = vld [vmem:[%s2589_s4 + $0x7c] sm:$0xff] }
  0xa9   :  { %614 = vmatpush.bf16.msra.mxu3 %v1999_v33 }
  0xaa   :  { %1590 = vmatmul.msk.bf16.gmra.mxu2 %vm184_vm1, %v169_v35  ;;  %1593 = vmatmul.msk.bf16.gmra.mxu3 %vm184_vm1, %v169_v35 }
  0xaf   :  { %v164_v37 = vpop.f32.mrf.mxu1  ;;  %v108_v41 = vpop.f32.mrf.mxu0 }
  0xb0   :  { %v170_v39 = vpack.c.bf16 %v164_v37, %v164_v37  ;;  %v114_v45 = vpack.c.bf16 %v108_v41, %v108_v41 }
  0xb7   :  { %v166_v40 = vpop.f32.mrf.mxu1  ;;  %v110_v42 = vpop.f32.mrf.mxu0 }
  0xba   :  { %1591 = vmatmul.msk.bf16.gmra.mxu2 %vm184_vm1, %v170_v39  ;;  %1594 = vmatmul.msk.bf16.gmra.mxu3 %vm184_vm1, %v170_v39 }
  0xca   :  { %1603 = vmatmul.msk.bf16.vlgmr.msrb.gmra.mxu2 %vm184_vm1, %v112_v43  ;;  %1606 = vmatmul.msk.bf16.vlgmr.msrb.gmra.mxu3 %vm184_vm1, %v112_v43 }
  0xda   :  { %1604 = vmatmul.msk.bf16.gmra.mxu2 %vm184_vm1, %v113_v44  ;;  %1607 = vmatmul.msk.bf16.gmra.mxu3 %vm184_vm1, %v113_v44 }
  0xea   :  { %1605 = vmatmul.msk.bf16.gmra.mxu2 %vm184_vm1, %v114_v45  ;;  %1608 = vmatmul.msk.bf16.gmra.mxu3 %vm184_vm1, %v114_v45 }
 0x11d   :  { %v203_v46 = vpop.f32.mrf.mxu2  ;;  %v226_v47 = vpop.f32.mrf.mxu3 }
 0x125   :  { %v205_v48 = vpop.f32.mrf.mxu2  ;;  %v228_v49 = vpop.f32.mrf.mxu3 }
 0x12d   :  { %v208_v50 = vpop.f32.mrf.mxu2  ;;  %v231_v51 = vpop.f32.mrf.mxu3 }
 0x135   :  { %v210_v52 = vpop.f32.mrf.mxu2  ;;  %v233_v53 = vpop.f32.mrf.mxu3 }
 0x13d   :  { %v213_v54 = vpop.f32.mrf.mxu2  ;;  %v236_v55 = vpop.f32.mrf.mxu3 }
 0x145   :  { %v215_v56 = vpop.f32.mrf.mxu2  ;;  %v238_v57 = vpop.f32.mrf.mxu3 }
 0x14d   :  { %v268_v58 = vpop.f32.mrf.mxu2  ;;  %v291_v59 = vpop.f32.mrf.mxu3 }
 0x14e   :  { %v269_v17 = vadd.f32 %v268_v58, %v203_v46  ;;  %v292_v20 = vadd.f32 %v291_v59, %v226_v47  ;;  %v1982_v59 = vld [vmem:[%s2590_s5] sm:$0xff] }
 0x150   :  { %v311_v29 = vadd.f32 %v307_v5, %v269_v17  ;;  %v312_v34 = vadd.f32 %v308_v6, %v292_v20 }
 0x152   :  { %v321_v47 = vmul.f32 0.1, %v311_v29 }
 0x155   :  { %v270_v60 = vpop.f32.mrf.mxu2  ;;  %v293_v61 = vpop.f32.mrf.mxu3 }
 0x156   :  { %v271_v13 = vadd.f32 %v270_v60, %v205_v48  ;;  %v294_v14 = vadd.f32 %v293_v61, %v228_v49  ;;  %v322_v48 = vmul.f32 0.1, %v312_v34  ;;  %v1983_v60 = vld [vmem:[%s2590_s5 + $0x8] sm:$0xff]  ;;  %v1990_v61 = vld [vmem:[%s2589_s4 + $0x30] sm:$0xff] }
 0x157   :  { %515 = vmatpush.bf16.msra.mxu2 %v1990_v61  ;;  %v2000_v61 = vld [vmem:[%s2591_s6] sm:$0xff] }
 0x158   :  { %v313_v25 = vadd.f32 %v307_v5, %v271_v13  ;;  %v314_v26 = vadd.f32 %v308_v6, %v294_v14  ;;  %v332_v56 = vmax.f32 %v312_v34, %v322_v48 }
 0x15a   :  { %v323_v41 = vmul.f32 0.1, %v313_v25  ;;  %v324_v42 = vmul.f32 0.1, %v314_v26 }
 0x15d   :  { %v273_v62 = vpop.f32.mrf.mxu2  ;;  %v296_v63 = vpop.f32.mrf.mxu3 }
 0x15e   :  { %v274_v7 = vadd.f32 %v273_v62, %v208_v50  ;;  %v297_v8 = vadd.f32 %v296_v63, %v231_v51  ;;  %v1998_v62 = vld [vmem:[%s2589_s4 + $0x74] sm:$0xff]  ;;  %v1989_v63 = vld [vmem:[%s2589_s4 + $0x28] sm:$0xff] }
 0x15f   :  { %615 = vmatpush.bf16.msra.mxu3 %v1998_v62  ;;  %516 = vmatpush.bf16.msra.mxu2 %v1989_v63  ;;  %v1714_v62 = vld [vmem:[%s2591_s6 + $0x14] sm:$0x1]  ;;  %v647_v63 = vld [vmem:[%s2591_s6 + $0x8] sm:$0x1] }
 0x160   :  { %v315_v21 = vadd.f32 %v307_v5, %v274_v7  ;;  %v316_v22 = vadd.f32 %v308_v6, %v297_v8  ;;  %v1985_v7 = vld [vmem:[%s2589_s4 + $0x8] sm:$0xff] }
 0x161   :  { %v1993_v8 = vld [vmem:[%s2589_s4 + $0x4c] sm:$0xff] }
 0x162   :  { %v325_v35 = vmul.f32 0.1, %v315_v21  ;;  %v326_v36 = vmul.f32 0.1, %v316_v22 }
 0x164   :  { %v335_v49 = vmax.f32 %v315_v21, %v325_v35  ;;  %v336_v50 = vmax.f32 %v316_v22, %v326_v36 }
 0x165   :  { %v275_v0 = vpop.f32.mrf.mxu2  ;;  %v298_v1 = vpop.f32.mrf.mxu3 }
 0x166   :  { %v276_v3 = vadd.f32 %v275_v0, %v210_v52  ;;  %v299_v4 = vadd.f32 %v298_v1, %v233_v53  ;;  %v333_v53 = vmax.f32 %v313_v25, %v323_v41  ;;  %v1997_v0 = vld [vmem:[%s2589_s4 + $0x6c] sm:$0xff]  ;;  %v1988_v1 = vld [vmem:[%s2589_s4 + $0x20] sm:$0xff]  ;;  %v1757_v41 = vld [vmem:[%s2592_s7 + $0x78] sm:$0xf0] }
 0x167   :  { %616 = vmatpush.bf16.msra.mxu3 %v1997_v0  ;;  %517 = vmatpush.bf16.msra.mxu2 %v1988_v1  ;;  %v699_v0 = vunpack.c.l.b16 %v1714_v62  ;;  %v653_v1 = vunpack.c.l.b16 %v647_v63  ;;  %v902_v62 = vld [vmem:[%s2593_s8] sm:$0x3] }
 0x168   :  { %v317_v15 = vadd.f32 %v307_v5, %v276_v3  ;;  %v318_v16 = vadd.f32 %v308_v6, %v299_v4  ;;  %v1987_v3 = vld [vmem:[%s2589_s4 + $0x18] sm:$0xff] }
 0x169   :  { %v1995_v4 = vld [vmem:[%s2589_s4 + $0x5c] sm:$0xff] }
 0x16a   :  { %v327_v27 = vmul.f32 0.1, %v317_v15  ;;  %v328_v28 = vmul.f32 0.1, %v318_v16 }
 0x16b   :  { %617 = vmatpush.bf16.msra.mxu3 %v1996_v2  ;;  %518 = vmatpush.bf16.msra.mxu2 %v1987_v3  ;;  %v701_v2 = vpack.c.b16 %v699_v0, %v699_v0  ;;  %v655_v3 = vpack.c.b16 %v653_v1, %v653_v1 }
 0x16c   :  { %v337_v43 = vmax.f32 %v317_v15, %v327_v27  ;;  %v338_v44 = vmax.f32 %v318_v16, %v328_v28  ;;  %v1984_v15 = vld [vmem:[%s2589_s4] sm:$0xff] }
 0x16d   :  { %v278_v9 = vpop.f32.mrf.mxu2  ;;  %v301_v10 = vpop.f32.mrf.mxu3  ;;  %v1992_v16 = vld [vmem:[%s2589_s4 + $0x44] sm:$0xff] }
 0x16e   :  { %v279_v11 = vadd.f32 %v278_v9, %v213_v54  ;;  %v302_v12 = vadd.f32 %v301_v10, %v236_v55  ;;  %v343_v51 = vpack.c.bf16 %v337_v43, %v335_v49  ;;  %v344_v52 = vpack.c.bf16 %v338_v44, %v336_v50  ;;  %v454_v9 = vld [vmem:[%s2589_s4 + $0x40] sm:$0xf]  ;;  %v1672_v10 = vld [vmem:[%s2589_s4 + $0x84] sm:$0xf]  ;;  %v1791_v50 = vld [vmem:[%s2592_s7 + $0x30] sm:$0xf] }
 0x16f   :  { %v334_v54 = vmax.f32 %v314_v26, %v324_v42  ;;  %v331_v55 = vmax.f32 %v311_v29, %v321_v47  ;;  %618 = vmatpush.bf16.msra.mxu3 %v1995_v4  ;;  %v1747_v4 = vld [vmem:[%s2592_s7 + $0x60] sm:$0xf] }
 0x170   :  { %v319_v18 = vadd.f32 %v307_v5, %v279_v11  ;;  %v320_v19 = vadd.f32 %v308_v6, %v302_v12  ;;  %v1986_v5 = vld [vmem:[%s2589_s4 + $0x10] sm:$0xff]  ;;  %v488_v11 = vunpack.c.l.b16 %v454_v9  ;;  %v593_v12 = vunpack.c.l.b16 %v1672_v10  ;;  %v1783_v9 = vld [vmem:[%s2592_s7 + $0x20] sm:$0xf]  ;;  %v2006_v10 = vld [vmem:[%s2592_s7 + $0x24] sm:$0xf0] }
 0x171   :  { %v341_v57 = vpack.c.bf16 %v333_v53, %v331_v55  ;;  %v342_v58 = vpack.c.bf16 %v334_v54, %v332_v56  ;;  %v1994_v6 = vld [vmem:[%s2589_s4 + $0x54] sm:$0xff]  ;;  %519 = vmatpush.bf16.msra.mxu2 %v1986_v5  ;;  %v1793_v54 = vld [vmem:[%s2592_s7 + $0x38] sm:$0xf0]  ;;  %v2015_v5 = vld [vmem:[%s2592_s7 + $0x64] sm:$0xf0]  ;;  %s1543_s4 = sshll.u32 %s2601_s16, 4  ;;  %s1544_s4 = int_to_ptr.hbm [resolvable:$true] %s1543_s4 }
 0x172   :  { %v329_v23 = vmul.f32 0.1, %v319_v18  ;;  %v330_v24 = vmul.f32 0.1, %v320_v19  ;;  %v497_v13 = vpack.c.b16 %v488_v11, %v488_v11  ;;  %v602_v14 = vpack.c.b16 %v593_v12, %v593_v12  ;;  %v2007_v53 = vld [vmem:[%s2592_s7 + $0x34] sm:$0xf] }
 0x173   :  { %619 = vmatpush.bf16.msra.mxu3 %v1994_v6  ;;  %v2014_v6 = vld [vmem:[%s2592_s7 + $0x64] sm:$0xf]  ;;  %v1784_v12 = vor.u32 %v2006_v10, %v1783_v9 }
 0x174   :  { %v339_v30 = vmax.f32 %v319_v18, %v329_v23  ;;  %v340_v31 = vmax.f32 %v320_v19, %v330_v24  ;;  %v512_v17 = vsel %vm510_vm4, %v497_v13, 0  ;;  %v612_v18 = vsel %vm510_vm4, %v602_v14, 0  ;;  %v2005_v13 = vld [vmem:[%s2592_s7 + $0x24] sm:$0xf]  ;;  %v1785_v14 = vld [vmem:[%s2592_s7 + $0x28] sm:$0xf0] }
 0x175   :  { %v280_v37 = vpop.f32.mrf.mxu2  ;;  %v303_v38 = vpop.f32.mrf.mxu3  ;;  %520 = vmatpush.bf16.msra.mxu2 %v1985_v7  ;;  %v1748_v7 = vor.u32 %v2015_v5, %v1747_v4  ;;  %v905_v4 = vperm.slane %v902_v62, 1 }
 0x176   :  { %v345_v39 = vpack.c.bf16 %v339_v30, %v339_v30  ;;  %v346_v40 = vpack.c.bf16 %v340_v31, %v340_v31  ;;  %v1755_v37 = vld [vmem:[%s2592_s7 + $0x70] sm:$0xf]  ;;  %v2017_v38 = vld [vmem:[%s2592_s7 + $0x74] sm:$0xf0] }
 0x177   :  { %620 = vmatpush.bf16.msra.mxu3 %v1993_v8  ;;  %v1749_v8 = vld [vmem:[%s2592_s7 + $0x68] sm:$0xf0] }
 0x178   :  { %v360_v45 = vsel %vm358_vm2, %v345_v39, 0  ;;  %v363_v46 = vsel %vm358_vm2, %v346_v40, 0  ;;  %v1756_v39 = vor.u32 %v2017_v38, %v1755_v37  ;;  %v2016_v40 = vld [vmem:[%s2592_s7 + $0x74] sm:$0xf]  ;;  %v1752_v11 = vor.u32 %v2014_v6, %v1749_v8  ;;  %v2001_v37 = vld [vmem:[%s2592_s7 + $0x4] sm:$0xf] }
 0x179   :  { %370 = vmatpush.bf16.msrb.mxu0 %v360_v45  ;;  %384 = vmatpush.bf16.msrb.mxu1 %v363_v46  ;;  %v1760_v42 = vor.u32 %v2016_v40, %v1757_v41  ;;  %v1769_v38 = vld [vmem:[%s2592_s7 + $0x8] sm:$0xf0] }
 0x17a   :  { %521 = vmatpush.bf16.msra.mxu2 %v1984_v15  ;;  %v1788_v15 = vor.u32 %v2005_v13, %v1785_v14 }
 0x17b   :  { %621 = vmatpush.bf16.msra.mxu3 %v1992_v16  ;;  %v1739_v16 = vld [vmem:[%s2592_s7 + $0x50] sm:$0xf] }
 0x17d   :  { %371 = vmatpush.bf16.msrb.mxu0 %v343_v51  ;;  %385 = vmatpush.bf16.msrb.mxu1 %v344_v52 }
 0x17e   :  { %788 = vmatpush.bf16.msrb.mxu2 %v1756_v39  ;;  %v1772_v39 = vor.u32 %v2001_v37, %v1769_v38 }
 0x17f   :  { %806 = vmatpush.bf16.msrb.mxu3 %v1760_v42 }
 0x181   :  { %372 = vmatpush.bf16.msrb.mxu0 %v341_v57  ;;  %386 = vmatpush.bf16.msrb.mxu1 %v342_v58 }
 0x182   :  { %789 = vmatpush.bf16.msrb.mxu2 %v1748_v7 }
 0x183   :  { %807 = vmatpush.bf16.msrb.mxu3 %v1752_v11 }
 0x184   :  { %1613 = vmatmul.msk.bf16.vlgmr.msrb.gmra.mxu0 %vm354_vm3, %v1982_v59  ;;  %1614 = vmatmul.msk.bf16.vlgmr.msrb.gmra.mxu1 %vm354_vm3, %v1982_v59 }
 0x185   :  { %409 = vmatpush.bf16.msra.mxu0 %v360_v45  ;;  %423 = vmatpush.bf16.msra.mxu1 %v363_v46 }
 0x189   :  { %410 = vmatpush.bf16.msra.mxu0 %v343_v51  ;;  %424 = vmatpush.bf16.msra.mxu1 %v344_v52  ;;  %v2008_v52 = vld [vmem:[%s2592_s7 + $0x34] sm:$0xf0] }
 0x18d   :  { %411 = vmatpush.bf16.msra.mxu0 %v341_v57  ;;  %425 = vmatpush.bf16.msra.mxu1 %v342_v58  ;;  %v1792_v57 = vor.u32 %v2008_v52, %v1791_v50  ;;  %v1796_v58 = vor.u32 %v2007_v53, %v1793_v54 }
 0x191   :  { %535 = vmatpush.bf16.msrb.mxu0 %v512_v17  ;;  %635 = vmatpush.bf16.msrb.mxu1 %v612_v18  ;;  %v2013_v17 = vld [vmem:[%s2592_s7 + $0x54] sm:$0xf0]  ;;  %v2012_v18 = vld [vmem:[%s2592_s7 + $0x54] sm:$0xf] }
 0x194   :  { %1621 = vmatmul.msk.bf16.vlgmr.msra.gmra.mxu0 %vm354_vm3, %v1983_v60  ;;  %1622 = vmatmul.msk.bf16.vlgmr.msra.gmra.mxu1 %vm354_vm3, %v1983_v60  ;;  %v2009_v60 = vld [vmem:[%s2591_s6 + $0xc] sm:$0xff] }
 0x201   :  { %v374_v19 = vpop.f32.mrf.mxu0  ;;  %v388_v20 = vpop.f32.mrf.mxu1 }
 0x209   :  { %v376_v21 = vpop.f32.mrf.mxu0  ;;  %v390_v22 = vpop.f32.mrf.mxu1 }
 0x211   :  { %v413_v23 = vpop.f32.mrf.mxu0  ;;  %v427_v24 = vpop.f32.mrf.mxu1 }
 0x212   :  { %v432_v27 = vmax.f32 %v374_v19, %v413_v23  ;;  %v433_v28 = vmax.f32 %v388_v20, %v427_v24  ;;  %v1740_v19 = vor.u32 %v2013_v17, %v1739_v16  ;;  %v1741_v20 = vld [vmem:[%s2592_s7 + $0x58] sm:$0xf0] }
 0x213   :  { %v1744_v23 = vor.u32 %v2012_v18, %v1741_v20  ;;  %v2024_v20 = vld [vmem:[%s2594_s9 + $0x30] sm:$0xff] }
 0x214   :  { %790 = vmatpush.bf16.msrb.mxu2 %v1740_v19 }
 0x215   :  { %808 = vmatpush.bf16.msrb.mxu3 %v1744_v23 }
 0x219   :  { %v415_v25 = vpop.f32.mrf.mxu0  ;;  %v429_v26 = vpop.f32.mrf.mxu1 }
 0x21a   :  { %v434_v29 = vmax.f32 %v376_v21, %v415_v25  ;;  %v435_v30 = vmax.f32 %v390_v22, %v429_v26  ;;  %v1775_v21 = vld [vmem:[%s2592_s7 + $0x10] sm:$0xf]  ;;  %v2004_v22 = vld [vmem:[%s2592_s7 + $0x14] sm:$0xf0]  ;;  %v2003_v25 = vld [vmem:[%s2592_s7 + $0x14] sm:$0xf] }
 0x21b   :  { %v1776_v24 = vor.u32 %v2004_v22, %v1775_v21  ;;  %v1777_v26 = vld [vmem:[%s2592_s7 + $0x18] sm:$0xf0] }
 0x21c   :  { %v436_v31 = vpack.c.bf16 %v434_v29, %v432_v27  ;;  %v437_v32 = vpack.c.bf16 %v435_v30, %v433_v28  ;;  %v1780_v27 = vor.u32 %v2003_v25, %v1777_v26  ;;  %v1731_v28 = vld [vmem:[%s2592_s7 + $0x40] sm:$0xf]  ;;  %v2011_v29 = vld [vmem:[%s2592_s7 + $0x44] sm:$0xf0]  ;;  %v2010_v30 = vld [vmem:[%s2592_s7 + $0x44] sm:$0xf] }
 0x21e   :  { %522 = vmatmul.bf16.vlgmr.msra.gmra.mxu2 %v436_v31  ;;  %1655 = vmatmul.msk.bf16.vlgmr.msrb.gmra.mxu0 %vm506_vm5, %v437_v32 }
 0x21f   :  { %622 = vmatmul.bf16.vlgmr.msra.gmra.mxu3 %v436_v31  ;;  %1705 = vmatmul.msk.bf16.vlgmr.msrb.gmra.mxu1 %vm506_vm5, %v437_v32  ;;  %v1732_v31 = vor.u32 %v2011_v29, %v1731_v28  ;;  %v1733_v32 = vld [vmem:[%s2592_s7 + $0x48] sm:$0xf0] }
 0x221   :  { %791 = vmatpush.bf16.msrb.mxu2 %v1732_v31  ;;  %v2023_v31 = vld [vmem:[%s2594_s9 + $0x28] sm:$0xff] }
 0x29b   :  { %v537_v33 = vpop.f32.mrf.mxu0 }
 0x29c   :  { %v637_v34 = vpop.f32.mrf.mxu1 }
 0x2a1   :  { %v523_v35 = vpop.f32.mrf.mxu2 }
 0x2a2   :  { %v623_v36 = vpop.f32.mrf.mxu3  ;;  %v538_v43 = vadd.f32 %v537_v33, %v523_v35  ;;  %v1767_v33 = vld [vmem:[%s2592_s7] sm:$0xf]  ;;  %v1736_v35 = vor.u32 %v2010_v30, %v1733_v32 }
 0x2a3   :  { %v638_v44 = vadd.f32 %v637_v34, %v623_v36  ;;  %v539_v45 = vpop.f32.mrf.mxu0  ;;  %v2002_v34 = vld [vmem:[%s2592_s7 + $0x4] sm:$0xf0] }
 0x2a4   :  { %v639_v47 = vpop.f32.mrf.mxu1  ;;  %v1768_v36 = vor.u32 %v2002_v34, %v1767_v33  ;;  %809 = vmatpush.bf16.msrb.mxu3 %v1736_v35 }
 0x2a5   :  { %v642_v55 = vmax.f32 %v538_v43, %v638_v44 }
 0x2a9   :  { %v525_v46 = vpop.f32.mrf.mxu2 }
 0x2aa   :  { %v540_v48 = vadd.f32 %v539_v45, %v525_v46  ;;  %v625_v49 = vpop.f32.mrf.mxu3 }
 0x2ab   :  { %v640_v51 = vadd.f32 %v639_v47, %v625_v49 }
 0x2ad   :  { %v643_v56 = vmax.f32 %v540_v48, %v640_v51 }
 0x2af   :  { %v644_v59 = vpack.c.bf16 %v643_v56, %v642_v55 }
 0x2b1   :  { %669 = vmatpush.bf16.msra.mxu0 %v644_v59  ;;  %715 = vmatpush.bf16.msra.mxu1 %v644_v59 }
 0x2b4   :  { %1719 = vmatmul.msk.bf16.vlgmr.msra.gmra.mxu1 %vm184_vm1, %v2009_v60  ;;  %1710 = vmatmul.msk.bf16.vlgmr.msra.gmra.mxu0 %vm184_vm1, %v2000_v61 }
 0x2b5   :  { %870 = vmatpush.bf16.msrb.mxu0 %v1792_v57  ;;  %888 = vmatpush.bf16.msrb.mxu1 %v1796_v58 }
 0x2b9   :  { %871 = vmatpush.bf16.msrb.mxu0 %v1784_v12  ;;  %889 = vmatpush.bf16.msrb.mxu1 %v1788_v15  ;;  %v2025_v15 = vld [vmem:[%s2594_s9 + $0x38] sm:$0xff] }
 0x2bd   :  { %872 = vmatpush.bf16.msrb.mxu0 %v1776_v24  ;;  %890 = vmatpush.bf16.msrb.mxu1 %v1780_v27 }
 0x2c1   :  { %873 = vmatpush.bf16.msrb.mxu0 %v1768_v36  ;;  %891 = vmatpush.bf16.msrb.mxu1 %v1772_v39 }
 0x2c4   :  { %1720 = vmatmul.msk.bf16.gmra.mxu1 %vm184_vm1, %v701_v2  ;;  %1711 = vmatmul.msk.bf16.gmra.mxu0 %vm184_vm1, %v655_v3  ;;  %v904_v2 = vperm.slane %v902_v62, 0 }
 0x2c5   :  { %1077 = vmatpush.bf16.msra.mxu0 %v2025_v15 }
 0x2c9   :  { %1078 = vmatpush.bf16.msra.mxu0 %v2024_v20 }
 0x2cd   :  { %1079 = vmatpush.bf16.msra.mxu0 %v2023_v31  ;;  %v2045_v31 = vld [vmem:[%s2597_s12 + $0x48] sm:$0xff] }
 0x331   :  { %v717_v40 = vpop.f32.mrf.mxu1  ;;  %v671_v41 = vpop.f32.mrf.mxu0 }
 0x339   :  { %v719_v42 = vpop.f32.mrf.mxu1  ;;  %v673_v43 = vpop.f32.mrf.mxu0 }
 0x33a   :  { %v726_v44 = vpack.c.bf16 %v719_v42, %v717_v40  ;;  %v680_v45 = vpack.c.bf16 %v673_v43, %v671_v41  ;;  %v930_v40 = vld [vmem:[%s2595_s10] sm:$0xf]  ;;  %v2033_v42 = vld [vmem:[%s2594_s9 + $0x78] sm:$0xff]  ;;  %v2032_v43 = vld [vmem:[%s2594_s9 + $0x70] sm:$0xff] }
 0x33b   :  { %v2034_v41 = vld [vmem:[%s2594_s9 + $0x80] sm:$0xff] }
 0x33c   :  { %1761 = vmatmul.msk.bf16.vlgmr.msrb.gmra.mxu2 %vm777_vm6, %v726_v44  ;;  %1763 = vmatmul.msk.bf16.vlgmr.msrb.gmra.mxu3 %vm777_vm6, %v726_v44  ;;  %v1803_v44 = vld [vmem:[%s2595_s10 + $0x4] sm:$0xf] }
 0x33d   :  { %1797 = vmatmul.msk.bf16.vlgmr.msrb.gmra.mxu0 %vm777_vm6, %v680_v45  ;;  %1799 = vmatmul.msk.bf16.vlgmr.msrb.gmra.mxu1 %vm777_vm6, %v680_v45  ;;  %v2022_v45 = vld [vmem:[%s2594_s9 + $0x20] sm:$0xff] }
 0x33e   :  { %1080 = vmatpush.bf16.msra.mxu0 %v2022_v45  ;;  %v2049_v45 = vld [vmem:[%s2597_s12 + $0x68] sm:$0xff] }
 0x341   :  { %v722_v46 = vpop.f32.mrf.mxu1  ;;  %v676_v47 = vpop.f32.mrf.mxu0 }
 0x342   :  { %v727_v48 = vpack.c.bf16 %v722_v46, %v722_v46  ;;  %v681_v49 = vpack.c.bf16 %v676_v47, %v676_v47  ;;  %v2031_v46 = vld [vmem:[%s2594_s9 + $0x68] sm:$0xff]  ;;  %v2021_v47 = vld [vmem:[%s2594_s9 + $0x18] sm:$0xff] }
 0x343   :  { %1081 = vmatpush.bf16.msra.mxu0 %v2021_v47 }
 0x349   :  { %v724_v50 = vpop.f32.mrf.mxu1  ;;  %v678_v51 = vpop.f32.mrf.mxu0 }
 0x34a   :  { %v2029_v50 = vld [vmem:[%s2594_s9 + $0x58] sm:$0xff]  ;;  %v2019_v51 = vld [vmem:[%s2594_s9 + $0x8] sm:$0xff] }
 0x34c   :  { %1762 = vmatmul.msk.bf16.gmra.mxu2 %vm777_vm6, %v727_v48  ;;  %1764 = vmatmul.msk.bf16.gmra.mxu3 %vm777_vm6, %v727_v48  ;;  %v2030_v48 = vld [vmem:[%s2594_s9 + $0x60] sm:$0xff] }
 0x34d   :  { %1798 = vmatmul.msk.bf16.gmra.mxu0 %vm777_vm6, %v681_v49  ;;  %1800 = vmatmul.msk.bf16.gmra.mxu1 %vm777_vm6, %v681_v49  ;;  %v2020_v49 = vld [vmem:[%s2594_s9 + $0x10] sm:$0xff] }
 0x34e   :  { %1082 = vmatpush.bf16.msra.mxu0 %v2020_v49 }
 0x352   :  { %1083 = vmatpush.bf16.msra.mxu0 %v2019_v51 }
 0x3ba   :  { %v875_v52 = vpop.f32.mrf.mxu0  ;;  %v893_v53 = vpop.f32.mrf.mxu1 }
 0x3bf   :  { %v793_v54 = vpop.f32.mrf.mxu2  ;;  %v811_v55 = vpop.f32.mrf.mxu3 }
 0x3c0   :  { %v876_v1 = vadd.f32 %v875_v52, %v793_v54  ;;  %v894_v3 = vadd.f32 %v893_v53, %v811_v55  ;;  %v2028_v52 = vld [vmem:[%s2594_s9 + $0x50] sm:$0xff]  ;;  %v2018_v53 = vld [vmem:[%s2594_s9] sm:$0xff]  ;;  %v2027_v55 = vld [vmem:[%s2594_s9 + $0x48] sm:$0xff] }
 0x3c1   :  { %v2026_v54 = vld [vmem:[%s2594_s9 + $0x40] sm:$0xff]  ;;  %1084 = vmatpush.bf16.msra.mxu0 %v2018_v53 }
 0x3c2   :  { %v877_v56 = vpop.f32.mrf.mxu0  ;;  %v895_v57 = vpop.f32.mrf.mxu1  ;;  %v908_v16 = vadd.f32 %v904_v2, %v876_v1  ;;  %v909_v17 = vadd.f32 %v905_v4, %v894_v3  ;;  %1097 = vmatpush.bf16.msra.mxu1 %v2026_v54 }
 0x3c4   :  { %v914_v25 = vmul.f32 0.1, %v908_v16  ;;  %v915_v26 = vmul.f32 0.1, %v909_v17 }
 0x3c6   :  { %v920_v36 = vmax.f32 %v908_v16, %v914_v25  ;;  %v921_v37 = vmax.f32 %v909_v17, %v915_v26  ;;  %v2039_v25 = vld [vmem:[%s2597_s12 + $0x18] sm:$0xff]  ;;  %v2038_v26 = vld [vmem:[%s2597_s12 + $0x10] sm:$0xff] }
 0x3c7   :  { %v795_v58 = vpop.f32.mrf.mxu2  ;;  %v813_v59 = vpop.f32.mrf.mxu3 }
 0x3c8   :  { %v878_v63 = vadd.f32 %v877_v56, %v795_v58  ;;  %v896_v0 = vadd.f32 %v895_v57, %v813_v59  ;;  %v2035_v56 = vld [vmem:[%s2594_s9 + $0x88] sm:$0xff] }
 0x3ca   :  { %v880_v60 = vpop.f32.mrf.mxu0  ;;  %v898_v61 = vpop.f32.mrf.mxu1  ;;  %v910_v9 = vadd.f32 %v904_v2, %v878_v63  ;;  %v911_v10 = vadd.f32 %v905_v4, %v896_v0 }
 0x3cc   :  { %v916_v21 = vmul.f32 0.1, %v910_v9  ;;  %v917_v22 = vmul.f32 0.1, %v911_v10 }
 0x3ce   :  { %v922_v32 = vmax.f32 %v910_v9, %v916_v21  ;;  %v923_v33 = vmax.f32 %v911_v10, %v917_v22  ;;  %v1899_v22 = vld [vmem:[%s2596_s11 + $0x1] sm:$0x1] }
 0x3cf   :  { %v798_v5 = vpop.f32.mrf.mxu2  ;;  %v816_v6 = vpop.f32.mrf.mxu3 }
 0x3d0   :  { %v881_v7 = vadd.f32 %v880_v60, %v798_v5  ;;  %v899_v8 = vadd.f32 %v898_v61, %v816_v6  ;;  %v926_v38 = vpack.c.bf16 %v922_v32, %v920_v36  ;;  %v927_v39 = vpack.c.bf16 %v923_v33, %v921_v37  ;;  %v2043_v5 = vld [vmem:[%s2597_s12 + $0x38] sm:$0xff]  ;;  %v2042_v6 = vld [vmem:[%s2597_s12 + $0x30] sm:$0xff]  ;;  %v2044_v32 = vld [vmem:[%s2597_s12 + $0x40] sm:$0xff] }
 0x3d2   :  { %v912_v11 = vadd.f32 %v904_v2, %v881_v7  ;;  %v913_v12 = vadd.f32 %v905_v4, %v899_v8  ;;  %v882_v13 = vpop.f32.mrf.mxu0  ;;  %v900_v14 = vpop.f32.mrf.mxu1  ;;  %v2041_v7 = vld [vmem:[%s2597_s12 + $0x28] sm:$0xff]  ;;  %v2040_v8 = vld [vmem:[%s2597_s12 + $0x20] sm:$0xff] }
 0x3d4   :  { %v918_v18 = vmul.f32 0.1, %v912_v11  ;;  %v919_v19 = vmul.f32 0.1, %v913_v12 }
 0x3d6   :  { %v924_v23 = vmax.f32 %v912_v11, %v918_v18  ;;  %v925_v24 = vmax.f32 %v913_v12, %v919_v19 }
 0x3d7   :  { %v800_v27 = vpop.f32.mrf.mxu2  ;;  %v818_v28 = vpop.f32.mrf.mxu3 }
 0x3d8   :  { %v928_v29 = vpack.c.bf16 %v924_v23, %v924_v23  ;;  %v929_v30 = vpack.c.bf16 %v925_v24, %v925_v24  ;;  %v1204_v23 = vld [vmem:[%s2596_s11] sm:$0x1]  ;;  %v1935_v24 = vld [vmem:[%s2596_s11 + $0x2] sm:$0x1]  ;;  %v2037_v27 = vld [vmem:[%s2597_s12 + $0x8] sm:$0xff] }
 0x3d9   :  { %v2047_v28 = vld [vmem:[%s2597_s12 + $0x58] sm:$0xff] }
 0x3da   :  { %v936_v34 = vsel %vm358_vm2, %v928_v29, 0  ;;  %v939_v35 = vsel %vm358_vm2, %v929_v30, 0  ;;  %v2036_v29 = vld [vmem:[%s2597_s12] sm:$0xff]  ;;  %v2046_v30 = vld [vmem:[%s2597_s12 + $0x50] sm:$0xff] }
 0x3db   :  { %947 = vmatpush.bf16.msra.mxu2 %v936_v34  ;;  %960 = vmatpush.bf16.msra.mxu3 %v939_v35 }
 0x3df   :  { %948 = vmatpush.bf16.msra.mxu2 %v926_v38  ;;  %961 = vmatpush.bf16.msra.mxu3 %v927_v39 }
 0x3e2   :  { %1801 = vmatmul.msk.bf16.vlgmr.msra.gmra.mxu2 %vm931_vm7, %v930_v40  ;;  %1802 = vmatmul.msk.bf16.vlgmr.msra.gmra.mxu3 %vm931_vm7, %v930_v40 }
 0x3e3   :  { %978 = vmatpush.bf16.msrb.mxu2 %v936_v34  ;;  %991 = vmatpush.bf16.msrb.mxu3 %v939_v35 }
 0x3e7   :  { %979 = vmatpush.bf16.msrb.mxu2 %v926_v38  ;;  %992 = vmatpush.bf16.msrb.mxu3 %v927_v39  ;;  %v1954_v39 = vld [vmem:[%s2596_s11 + $0x3] sm:$0x1] }
 0x3eb   :  { %1176 = vmatpush.bf16.msra.mxu2 %v2034_v41  ;;  %1196 = vmatpush.bf16.msra.mxu3 %v2035_v56 }
 0x3ef   :  { %1177 = vmatpush.bf16.msra.mxu2 %v2033_v42 }
 0x3f2   :  { %1804 = vmatmul.msk.bf16.vlgmr.msrb.gmra.mxu2 %vm931_vm7, %v1803_v44  ;;  %1805 = vmatmul.msk.bf16.vlgmr.msrb.gmra.mxu3 %vm931_vm7, %v1803_v44  ;;  %v2050_v44 = vld [vmem:[%s2597_s12 + $0x70] sm:$0xff] }
 0x3f3   :  { %1178 = vmatpush.bf16.msra.mxu2 %v2032_v43  ;;  %1291 = vmatpush.bf16.msrb.mxu3 %v2043_v5  ;;  %v2051_v43 = vld [vmem:[%s2597_s12 + $0x78] sm:$0xff] }
 0x3f7   :  { %1179 = vmatpush.bf16.msra.mxu2 %v2031_v46  ;;  %1292 = vmatpush.bf16.msrb.mxu3 %v2042_v6  ;;  %v2048_v46 = vld [vmem:[%s2597_s12 + $0x60] sm:$0xff] }
 0x3fb   :  { %1180 = vmatpush.bf16.msra.mxu2 %v2030_v48  ;;  %1293 = vmatpush.bf16.msrb.mxu3 %v2041_v7 }
 0x3ff   :  { %1181 = vmatpush.bf16.msra.mxu2 %v2029_v50  ;;  %1294 = vmatpush.bf16.msrb.mxu3 %v2040_v8 }
 0x403   :  { %1182 = vmatpush.bf16.msra.mxu2 %v2028_v52 }
 0x407   :  { %1183 = vmatpush.bf16.msra.mxu2 %v2027_v55 }
 0x40b   :  { %1398 = vmatpush.bf16.msrb.mxu2 %v2047_v28 }
 0x40f   :  { %1399 = vmatpush.bf16.msrb.mxu2 %v2046_v30 }
 0x413   :  { %1400 = vmatpush.bf16.msrb.mxu2 %v2045_v31 }
 0x417   :  { %1401 = vmatpush.bf16.msrb.mxu2 %v2044_v32 }
 0x465   :  { %v950_v57 = vpop.f32.mrf.mxu2  ;;  %v963_v58 = vpop.f32.mrf.mxu3 }
 0x46d   :  { %v952_v59 = vpop.f32.mrf.mxu2  ;;  %v965_v60 = vpop.f32.mrf.mxu3 }
 0x46e   :  { %v2053_v60 = vld [vmem:[%s2598_s13] ss:$0 sm:$0xff]  ;;  %s2085_s13 = smov [#allocation2]  }
 0x475   :  { %v981_v61 = vpop.f32.mrf.mxu2  ;;  %v994_v62 = vpop.f32.mrf.mxu3 }
 0x476   :  { %v998_v63 = vmax.f32 %v950_v57, %v981_v61  ;;  %v999_v0 = vmax.f32 %v963_v58, %v994_v62  ;;  %v1484_v58 = vld [vmem:[%s2599_s14] sm:$0x1]  ;;  %s1541_s14 = sshll.u32 %s2085_s13, 4  ;;  %s1542_s14 = int_to_ptr.vmem [resolvable:$true] %s1541_s14 }
 0x477   :  { %v1493_v59 = vsel %vm79_vm0, %v1484_v58, 0 }
 0x478   :  { %v1000_v1 = vpack.c.bf16 %v998_v63, %v998_v63  ;;  %v1001_v2 = vpack.c.bf16 %v999_v0, %v999_v0 }
 0x47a   :  { %1085 = vmatmul.bf16.vlgmr.msra.gmra.mxu0 %v1000_v1  ;;  %1842 = vmatmul.msk.bf16.vlgmr.msra.gmra.mxu1 %vm184_vm1, %v1001_v2 }
 0x47b   :  { %1184 = vmatmul.bf16.vlgmr.msra.gmra.mxu2 %v1000_v1  ;;  %1897 = vmatmul.msk.bf16.vlgmr.msra.gmra.mxu3 %vm184_vm1, %v1001_v2 }
 0x47d   :  { %v983_v3 = vpop.f32.mrf.mxu2  ;;  %v996_v4 = vpop.f32.mrf.mxu3 }
 0x47e   :  { %v2054_v4 = vld [vmem:[%s2600_s15] ss:$0 sm:$0xff] }
 0x4f7   :  { %v1086_v9 = vpop.f32.mrf.mxu0  ;;  %v1099_v10 = vpop.f32.mrf.mxu1 }
 0x4f8   :  { %v1100_v13 = vadd.f32 %v1099_v10, %v1086_v9 }
 0x4fe   :  { %v1185_v11 = vpop.f32.mrf.mxu2  ;;  %v1198_v12 = vpop.f32.mrf.mxu3 }
 0x4ff   :  { %v1199_v14 = vadd.f32 %v1198_v12, %v1185_v11  ;;  %v1088_v15 = vpop.f32.mrf.mxu0  ;;  %v1101_v16 = vpop.f32.mrf.mxu1 }
 0x501   :  { %v1202_v17 = vmax.f32 %v1100_v13, %v1199_v14 }
 0x503   :  { %v1203_v18 = vpack.c.bf16 %v1202_v17, %v1202_v17 }
 0x505   :  { %v1209_v19 = vsel %vm510_vm4, %v1203_v18, 0 }
 0x506   :  { %v1187_v20 = vpop.f32.mrf.mxu2  ;;  %v1200_v21 = vpop.f32.mrf.mxu3  ;;  %1245 = vmatpush.bf16.msrb.mxu1 %v1209_v19  ;;  %1218 = vmatpush.bf16.msrb.mxu0 %v1209_v19 }
 0x507   :  { %1420 = vmatpush.bf16.msra.mxu3 %v1209_v19 }
 0x509   :  { %1900 = vmatmul.msk.bf16.vlgmr.msrb.gmra.mxu1 %vm506_vm5, %v1899_v22  ;;  %1898 = vmatmul.msk.bf16.vlgmr.msrb.gmra.mxu0 %vm506_vm5, %v1204_v23 }
 0x50a   :  { %1352 = vmatpush.bf16.msra.mxu1 %v1209_v19  ;;  %1331 = vmatpush.bf16.msra.mxu0 %v2039_v25 }
 0x50e   :  { %1332 = vmatpush.bf16.msra.mxu0 %v2038_v26  ;;  %1502 = vmatpush.bf16.xpose.msrb.mxu1 %v1493_v59 }
 0x512   :  { %1333 = vmatpush.bf16.msra.mxu0 %v2037_v27 }
 0x516   :  { %1334 = vmatpush.bf16.msra.mxu0 %v2036_v29 }
 0x519   :  { %1936 = vmatmul.msk.bf16.vlgmr.msra.gmra.mxu1 %vm506_vm5, %v1935_v24 }
 0x51a   :  { %1466 = vmatpush.bf16.msrb.mxu0 %v2051_v43 }
 0x51e   :  { %1467 = vmatpush.bf16.msrb.mxu0 %v2050_v44 }
 0x522   :  { %1468 = vmatpush.bf16.msrb.mxu0 %v2049_v45 }
 0x526   :  { %1469 = vmatpush.bf16.msrb.mxu0 %v2048_v46 }
 0x586   :  { %v1247_v33 = vpop.f32.mrf.mxu1  ;;  %v1220_v34 = vpop.f32.mrf.mxu0 }
 0x587   :  { %v1251_v35 = vpack.c.bf16 %v1247_v33, %v1247_v33  ;;  %v1224_v36 = vpack.c.bf16 %v1220_v34, %v1220_v34 }
 0x589   :  { %1917 = vmatmul.msk.bf16.vlgmr.msrb.gmra.mxu3 %vm777_vm6, %v1251_v35  ;;  %1934 = vmatmul.msk.bf16.vlgmr.msra.gmra.mxu0 %vm777_vm6, %v1224_v36 }
 0x58e   :  { %v1249_v37 = vpop.f32.mrf.mxu1  ;;  %v1222_v38 = vpop.f32.mrf.mxu0 }
 0x596   :  { %v1354_v40 = vpop.f32.mrf.mxu1 }
 0x597   :  { %v1358_v41 = vpack.c.bf16 %v1354_v40, %v1354_v40 }
 0x599   :  { %1955 = vmatmul.msk.bf16.vlgmr.msra.gmra.mxu3 %vm506_vm5, %v1954_v39  ;;  %1953 = vmatmul.msk.bf16.vlgmr.msrb.gmra.mxu2 %vm777_vm6, %v1358_v41 }
 0x59e   :  { %v1356_v42 = vpop.f32.mrf.mxu1 }
 0x606   :  { %v1336_v47 = vpop.f32.mrf.mxu0 }
 0x60c   :  { %v1296_v48 = vpop.f32.mrf.mxu3 }
 0x60d   :  { %v1337_v49 = vadd.f32 %v1336_v47, %v1296_v48 }
 0x60e   :  { %v1338_v50 = vpop.f32.mrf.mxu0 }
 0x614   :  { %v1298_v51 = vpop.f32.mrf.mxu3 }
 0x61c   :  { %v1422_v52 = vpop.f32.mrf.mxu3  ;;  %v1403_v53 = vpop.f32.mrf.mxu2 }
 0x61d   :  { %v1426_v54 = vpack.c.bf16 %v1422_v52, %v1422_v52  ;;  %v1407_v55 = vadd.f32 %v1403_v53, %v1337_v49 }
 0x61f   :  { %1972 = vmatmul.msk.bf16.vlgmr.msrb.gmra.mxu0 %vm777_vm6, %v1426_v54 }
 0x624   :  { %v1424_v56 = vpop.f32.mrf.mxu3  ;;  %v1405_v57 = vpop.f32.mrf.mxu2 }
 0x69c   :  { %v1471_v61 = vpop.f32.mrf.mxu0 }
 0x69d   :  { %v1475_v62 = vadd.f32 %v1471_v61, %v1407_v55 }
 0x69f   :  { %v1480_v63 = vadd.f32 %v2053_v60, %v1475_v62 }
 0x6a1   :  { %v1481_v0 = vmul.f32 0.1, %v1480_v63 }
 0x6a3   :  { %v1482_v1 = vmax.f32 %v1480_v63, %v1481_v0 }
 0x6a4   :  { %v1473_v2 = vpop.f32.mrf.mxu0 }
 0x6a5   :  { %v1483_v3 = vpack.c.bf16 %v1482_v1, %v1482_v1 }
 0x6a7   :  { %1973 = vmatmul.msk.bf16.vlgmr.msrb.gmra.mxu1 %vm79_vm0, %v1483_v3 }
 0x724   :  { %v1504_v5 = vpop.f32.mrf.mxu1 }
 0x725   :  { %v1505_v6 = vadd.f32 %v2054_v4, %v1504_v5 }
 0x727   :  { %v1508_v7 = vmul.f32 0.1, %v1505_v6 }
 0x729   :  { %v1509_v8 = vmax.f32 %v1505_v6, %v1508_v7 }
 0x72b   :  { %v1511_v9 = vsel %vm1510_vm8, %v1509_v8, -inf }
 0x72c   :  { %v1506_v10 = vpop.f32.mrf.mxu1  ;;  %1512 = vmax.xlane.f32.xlu0 %v1511_v9 }
 0x79f   :  { %v1513_v11 = vpop.xlane.xlu0 %1512 }
 0x7a0   :  { %v1514_v12 = vsub.f32 %v1509_v8, %v1513_v11 }
 0x7a2   :  { %v1515_v13 = vmul.f32 1.442695, %v1514_v12 }
 0x7a4   :  { %2055 = vpow2.f32 %v1515_v13 }
 0x7aa   :  { %v2056_v14 = vpop.eup %2055 }
 0x7ab   :  { %v1517_v15 = vsel %vm1510_vm8, %v2056_v14, 0.0 }
 0x7ac   :  { %1518 = vadd.xlane.f32.xlu0 %v1517_v15 }
 0x81f   :  { %v1519_v16 = vpop.xlane.xlu0 %1518 }
 0x820   :  { %2057 = vrcp.f32 %v1519_v16  ;;  %v1531_v20 = vand.u32 2147483648, %v1519_v16  ;;  %v1529_v22 = vand.u32 2147483647, %v1519_v16  ;;  %vm1525_vm10 = vweird.f32 %v1519_v16 }
 0x822   :  { %v1532_v24 = vor.u32 1.1754944e-38, %v1531_v20  ;;  %vm1530_vm12 = vcmp.eq.f32.partialorder %v1529_v22, 8.507059e+37 }
 0x826   :  { %v2058_v17 = vpop.eup %2057 }
 0x827   :  { %v1521_v18 = vmul.f32 %v2058_v17, %v1519_v16  ;;  %vm1526_vm9 = vweird.f32 %v2058_v17 }
 0x828   :  { %vm1527_vm11 = vmor %vm1525_vm10, %vm1526_vm9 }
 0x829   :  { %v1522_v19 = vsub.f32 1.0, %v1521_v18 }
 0x82b   :  { %v1523_v21 = vmul.f32 %v2058_v17, %v1522_v19 }
 0x82d   :  { %v1524_v23 = vadd.f32 %v2058_v17, %v1523_v21 }
 0x82f   :  { %v1528_v25 = vsel %vm1527_vm11, %v2058_v17, %v1524_v23 }
 0x830   :  { %v1533_v26 = vsel %vm1530_vm12, %v1532_v24, %v1528_v25 }
 0x831   :  { %v1534_v27 = vmul.f32 %v2056_v14, %v1533_v26 }
 0x833   :  { %1535 = vst.msk [vmem:[#allocation2] sm:$0x3] %vm1510_vm8, %v1534_v27 }
 0x834   :  { %1546 = dma.vmem_to_hbm [thread:$0]  %s1542_s14, 32, %s1544_s4, [#allocation3]  }
 0x835   :  { %2083 = dma.done.wait [#allocation3], 32  }
 0x836   :  { %2084 = vsyncadd [#allocation3], 4294967264 }
 0x837   :  { %1551 = vsyncpa [#allocation3], 1 }

</bundles_post_ra>
